<compile_context>
chip_gen: v6e
topology: v6e:2x2x1
jax: 0.10.0
libtpu: 0.0.40
codegen_flags: <defaults>
</compile_context>

<pallas_src>
import functools
import math

import numpy as np
import jax
import jax.numpy as jnp
from jax.experimental import pallas as pl
from jax.experimental.pallas import tpu as pltpu


def _round_up(x: int, m: int) -> int:
    return (x + m - 1) // m * m


def _sublane_pack(dtype) -> int:
    # Sublane pack of the dtype: 8 (f32), 16 (bf16), 32 (int8/fp8).
    return max(8, 8 * (4 // jnp.dtype(dtype).itemsize))


def _hadamard_matrix(n: int) -> np.ndarray:
    """Sylvester-construction Hadamard matrix of size n (n must be a power of 2)."""
    assert n > 0 and n & (n - 1) == 0
    H = np.array([[1.0]], dtype=np.float64)
    while H.shape[0] < n:
        H = np.block([[H, H], [H, -H]])
    return H


def _fwht_last_axis(x):
    """x @ H (natural-ordered Sylvester Hadamard) along the last axis, O(n log n)."""
    n = x.shape[-1]
    assert n > 0 and n & (n - 1) == 0
    shape = x.shape
    h, y = 1, x
    while h < n:
        y = y.reshape(shape[:-1] + (n // (2 * h), 2, h))
        a, b = y[..., 0, :], y[..., 1, :]
        y = jnp.stack([a + b, a - b], axis=-2)
        h *= 2
    return y.reshape(shape)


def _vmem_budget_bytes() -> int:
    """Generation-aware usable-VMEM budget (leaves headroom for Mosaic internals)."""
    cap = 64 << 20  # conservative fallback = v7x per-TC physical VMEM
    try:
        info = pltpu.get_tpu_info()
        cap = int(getattr(info, "vmem_capacity_bytes", cap) or cap)
    except Exception:
        pass
    if cap <= (64 << 20):                                   # v7x
        return max(min(cap - (12 << 20), 52 << 20), 16 << 20)
    return max(min(cap - (28 << 20), 100 << 20), 16 << 20)  # v5e / v6e (128 MiB)


@functools.lru_cache(maxsize=1)
def _roll_matches_jnp() -> bool:
    """Probe pltpu.roll's rotation direction once with a tiny kernel.

    True  -> pltpu.roll(x, s)[i] == x[(i - s) % n]  (same convention as jnp.roll)
    False -> opposite convention.
    """
    def k(x_ref, o_ref):
        o_ref[...] = pltpu.roll(x_ref[...], 1, axis=1)

    try:
        x = jnp.arange(8 * 128, dtype=jnp.float32).reshape(8, 128)
        y = pl.pallas_call(k, out_shape=jax.ShapeDtypeStruct((8, 128), jnp.float32))(x)
        return bool(jnp.array_equal(y, jnp.roll(x, 1, axis=1)))
    except Exception:
        return True


# --------------------------------------------------------------------------------------
# Kernels
# --------------------------------------------------------------------------------------

def _fused_kernel(x_ref, wf_ref, b_ref, o_ref):
    # x_ref:(tm, D_in_p)  wf_ref:(D_in_p, tn) = (H_norm @ W.T) tile  b_ref:(1, tn) f32
    y = jnp.dot(x_ref[...], wf_ref[...], preferred_element_type=jnp.float32) + b_ref[...]
    o_ref[...] = y.astype(o_ref.dtype)


def _unfused_kernel(x_ref, wt_ref, b_ref, o_ref, rot_ref, *,
                    strides, scale, n_lanes, roll_like_jnp):
    # Faithful two-step path: the Hadamard rotation is an in-kernel FWHT (exact f32
    # adds via pltpu.roll butterflies), computed once per row tile (j == 0) into a VMEM
    # scratch in the activation dtype (preserving the module's intermediate cast), then
    # reused for every N tile.  No D_in^2 matrix is ever materialized.
    @pl.when(pl.program_id(1) == 0)
    def _():
        v = x_ref[...].astype(jnp.float32)
        lane = jax.lax.broadcasted_iota(jnp.int32, (1, n_lanes), 1)
        for s in strides:
            sh_plus = (n_lanes - s) if roll_like_jnp else s     # partner at lane i + s
            sh_minus = s if roll_like_jnp else (n_lanes - s)    # partner at lane i - s
            up = pltpu.roll(v, sh_plus, axis=1)
            dn = pltpu.roll(v, sh_minus, axis=1)
            keep = (lane & s) == 0
            v = jnp.where(keep, v + up, dn - v)
        rot_ref[...] = (v * scale).astype(rot_ref.dtype)

    y = jnp.dot(rot_ref[...], wt_ref[...], preferred_element_type=jnp.float32) + b_ref[...]
    o_ref[...] = y.astype(o_ref.dtype)


# --------------------------------------------------------------------------------------
# Public API: prepare once at weight-load time, apply per forward call.
# --------------------------------------------------------------------------------------

def make_rotate_linear(weight, bias=None, *, fuse_rotation=True, act_dtype=None,
                       tm=None, tn=None):
    """Build forward(x) for RotateLinear (online_full_had=True, K=1).

    All weight-side preparation (Hadamard fold via FWHT, transpose, lane-dense padding)
    happens here, ONCE -- not on every forward call.

    fuse_rotation=True  : fold H_norm into the weight -> single MXU matmul per tile.
                          (Use when nothing sits between rotation and linear.)
    fuse_rotation=False : faithful two-step path; the rotated activations are cast to
                          the activation dtype before the linear matmul, matching the
                          original module (fp32_had=False).  Prefer the fused path for
                          decode-shaped (tiny-M) calls: its N axis stays megacore-parallel.
    """
    D_out, D_in = weight.shape
    assert D_in > 0 and D_in & (D_in - 1) == 0, \
        "in_features must be a power of two for the K=1 Hadamard path"
    dtype = jnp.dtype(act_dtype) if act_dtype is not None else jnp.dtype(weight.dtype)
    itm = dtype.itemsize
    pack = _sublane_pack(dtype)
    scale = 1.0 / math.sqrt(D_in)

    D_in_p = _round_up(D_in, 128)
    budget = _vmem_budget_bytes()

    # ---- output-feature tile (fixed at prep time so the weight is padded exactly once).
    if tn is None:
        tn_cap = _round_up(D_out, 128)
        tn = 128
        for cand in (512, 384, 256):
            # Weight-tile double buffer must leave >= ~60% of the budget for x/out tiles.
            if cand <= tn_cap and 2 * D_in_p * cand * itm <= 0.4 * budget:
                tn = cand
                break
    tn = max(128, _round_up(int(tn), 128))
    D_out_p = _round_up(D_out, tn)
    num_j = D_out_p // tn

    # ---- one-time weight / bias preparation (weight-load time, NOT per forward call).
    if fuse_rotation:
        # H_norm @ W.T == fwht(W, axis=-1).T / sqrt(D_in): exact +/- adds in f32,
        # O(D_out * D_in * log D_in) -- no HIGHEST-precision matmul per call.
        w_prep = (_fwht_last_axis(jnp.asarray(weight, jnp.float32)).T * scale).astype(dtype)
    else:
        w_prep = jnp.asarray(weight, dtype).T
    if w_prep.shape != (D_in_p, D_out_p):
        w_prep = jnp.pad(w_prep, ((0, D_in_p - D_in), (0, D_out_p - D_out)))
    if bias is None:
        b_prep = jnp.zeros((1, D_out_p), jnp.float32)
    else:
        b_prep = jnp.zeros((1, D_out_p), jnp.float32).at[0, :D_out].set(
            jnp.asarray(bias, jnp.float32))

    strides = tuple(1 << k for k in range(int(round(math.log2(D_in)))))
    roll_like_jnp = True if fuse_rotation else _roll_matches_jnp()
    w_bytes = D_in_p * D_out_p * itm

    def forward(x):
        assert x.shape[-1] == D_in, f"expected last dim {D_in}, got {x.shape}"
        lead = x.shape[:-1]
        M = int(np.prod(lead)) if lead else 1
        x2d = jnp.asarray(x, dtype).reshape(M, D_in)

        # ---- row tile from the VMEM budget (the biggest lever: large tm keeps the
        #      fused matmul MXU-bound instead of weight-streaming bound on v6e/v7x).
        tm_cap = _round_up(M, pack)
        extra = 0 if fuse_rotation else D_in_p * itm  # per-row rotation scratch (unfused)

        def fits(t):
            need = (2 * t * D_in_p * itm       # x tile (double-buffered)
                    + 2 * D_in_p * tn * itm    # weight tile (double-buffered)
                    + 2 * 8 * tn * 4           # bias tile (sublane-padded)
                    + 2 * t * tn * itm         # output tile
                    + t * extra)               # unfused rotation scratch (single buffer)
            return need <= 0.9 * budget

        if tm is not None:
            tm_eff = min(max(pack, _round_up(int(tm), pack)), tm_cap)
        else:
            cands = sorted({c for c in (1024, 768, 512, 384, 256, 192, 128, 96, 64, 32,
                                        16, 8)
                            if c < tm_cap and c % pack == 0} | {tm_cap}, reverse=True)
            tm_eff = next((c for c in cands if fits(c)), pack)
        Mp = _round_up(M, tm_eff)
        num_i = Mp // tm_eff

        # Lane/sublane padding only when actually needed (avoids extra HBM passes for
        # the common power-of-2 D_in >= 128 / aligned-M case).
        if Mp != M or D_in_p != D_in:
            x2d = jnp.pad(x2d, ((0, Mp - M), (0, D_in_p - D_in)))

        out_shape = jax.ShapeDtypeStruct((Mp, D_out_p), dtype)
        vmem_limit = int(budget)

        if fuse_rotation:
            # Grid order minimizing HBM re-reads: rows-outer re-streams the weight num_i
            # times; cols-outer re-streams x num_j times (decode-shaped M < D_out).
            rows_outer = (num_i * w_bytes) <= (num_j * Mp * D_in_p * itm)
            if rows_outer:
                grid = (num_i, num_j)
                xi = lambda i, j: (i, 0)
                wi = lambda i, j: (0, j)
                bi = lambda i, j: (0, j)
                oi = lambda i, j: (i, j)
                w_rereads, x_rereads = num_i, 1
            else:
                grid = (num_j, num_i)
                xi = lambda j, i: (i, 0)
                wi = lambda j, i: (0, j)
                bi = lambda j, i: (0, j)
                oi = lambda j, i: (i, j)
                w_rereads, x_rereads = 1, num_j
            bytes_accessed = (x_rereads * Mp * D_in_p * itm + w_rereads * w_bytes
                              + D_out_p * 4 + Mp * D_out_p * itm)
            out2d = pl.pallas_call(
                _fused_kernel,
                out_shape=out_shape,
                grid_spec=pltpu.PrefetchScalarGridSpec(
                    num_scalar_prefetch=0, grid=grid,
                    in_specs=[pl.BlockSpec((tm_eff, D_in_p), xi),
                              pl.BlockSpec((D_in_p, tn), wi),
                              pl.BlockSpec((1, tn), bi)],
                    out_specs=pl.BlockSpec((tm_eff, tn), oi)),
                compiler_params=pltpu.CompilerParams(
                    dimension_semantics=("parallel", "parallel"),
                    vmem_limit_bytes=vmem_limit),
                cost_estimate=pl.CostEstimate(
                    flops=int(2 * Mp * D_in_p * D_out_p), transcendentals=0,
                    bytes_accessed=int(bytes_accessed)),
            )(x2d, w_prep, b_prep)
        else:
            kern = functools.partial(_unfused_kernel, strides=strides, scale=scale,
                                     n_lanes=D_in_p, roll_like_jnp=roll_like_jnp)
            bytes_accessed = (Mp * D_in_p * itm + num_i * w_bytes
                              + num_i * D_out_p * 4 + Mp * D_out_p * itm)
            flops = 2 * Mp * D_in_p * D_out_p + 3 * Mp * D_in_p * max(len(strides), 1)
            out2d = pl.pallas_call(
                kern,
                out_shape=out_shape,
                grid_spec=pltpu.PrefetchScalarGridSpec(
                    num_scalar_prefetch=0, grid=(num_i, num_j),
                    in_specs=[pl.BlockSpec((tm_eff, D_in_p), lambda i, j: (i, 0)),
                              pl.BlockSpec((D_in_p, tn), lambda i, j: (0, j)),
                              pl.BlockSpec((1, tn), lambda i, j: (0, j))],
                    out_specs=pl.BlockSpec((tm_eff, tn), lambda i, j: (i, j)),
                    scratch_shapes=[pltpu.VMEM((tm_eff, D_in_p), dtype)]),
                compiler_params=pltpu.CompilerParams(
                    # j stays "arbitrary": the rotation scratch written at j == 0 is
                    # reused by every N tile of the same row tile.
                    dimension_semantics=("parallel", "arbitrary"),
                    vmem_limit_bytes=vmem_limit),
                cost_estimate=pl.CostEstimate(flops=int(flops), transcendentals=0,
                                              bytes_accessed=int(bytes_accessed)),
            )(x2d, w_prep, b_prep)

        if Mp != M or D_out_p != D_out:
            out2d = out2d[:M, :D_out]
        return out2d.reshape(lead + (D_out,))

    return forward


if __name__ == "__main__":
    # Small shapes: batch=2, seq=8, in_features=32 (power of 2), out_features=48
    B, S, D_in, D_out = 2, 8, 32, 48

    key = jax.random.PRNGKey(0)
    kx, kw, kb = jax.random.split(key, 3)
    x = jax.random.normal(kx, (B, S, D_in), dtype=jnp.float32)
    weight = jax.random.normal(kw, (D_out, D_in), dtype=jnp.float32) * 0.05
    bias = jax.random.normal(kb, (D_out,), dtype=jnp.float32) * 0.01

    # Weight-load-time preparation (done once), then per-call application.
    fwd_fused = make_rotate_linear(weight, bias, fuse_rotation=True)
    fwd_exact = make_rotate_linear(weight, bias, fuse_rotation=False)

    out_fused = jax.block_until_ready(fwd_fused(x))
    out_exact = jax.block_until_ready(fwd_exact(x))

    assert out_fused.shape == (B, S, D_out)
    assert out_exact.shape == (B, S, D_out)

    # float64 numpy reference of the module semantics.
    H = _hadamard_matrix(D_in) / math.sqrt(D_in)
    x64 = np.asarray(x, np.float64).reshape(-1, D_in)
    ref = ((x64 @ H) @ np.asarray(weight, np.float64).T
           + np.asarray(bias, np.float64)).reshape(B, S, D_out)

    # MXU f32 matmuls run at the TPU default precision (bf16-pass rounding), so compare
    # against the fp64 reference with a tolerance comfortably above that rounding level.
    np.testing.assert_allclose(np.asarray(out_exact, np.float64), ref, rtol=2e-2, atol=2e-2)
    np.testing.assert_allclose(np.asarray(out_fused, np.float64), ref, rtol=2e-2, atol=2e-2)

    print("KERNEL_OK")
</pallas_src>

<mosaic_0001>
module attributes {stable_mosaic.version = 11 : i64} {
  func.func @k(%arg0: memref<8x128xf32, #tpu.memory_space<vmem>>, %arg1: memref<8x128xf32, #tpu.memory_space<vmem>>) attributes {dimension_semantics = [], scalar_prefetch = 0 : i64, scratch_operands = 0 : i64, tpu.core_type = #tpu.core_type<tc>} {
    %c0 = arith.constant 0 : index
    %c0_0 = arith.constant 0 : index
    %0 = vector.load %arg0[%c0, %c0_0] : memref<8x128xf32, #tpu.memory_space<vmem>>, vector<8x128xf32>
    %c1_i32 = arith.constant 1 : i32
    %1 = tpu.dynamic_rotate %0 by %c1_i32 dim 1 : vector<8x128xf32>, i32 -> vector<8x128xf32>
    %c0_1 = arith.constant 0 : index
    %c0_2 = arith.constant 0 : index
    %2 = vector.load %arg1[%c0_1, %c0_2] : memref<8x128xf32, #tpu.memory_space<vmem>>, vector<8x128xf32>
    tpu.vector_store %arg1[%c0_1, %c0_2], %1 {strides = array<i32>} : memref<8x128xf32, #tpu.memory_space<vmem>>, vector<8x128xf32>,
    return
  }
}

module attributes {stable_mosaic.version = 11 : i64} {
  func.func @_fused_kernel(%arg0: i32, %arg1: i32, %arg2: memref<16x128xf32, #tpu.memory_space<vmem>>, %arg3: memref<128x128xf32, #tpu.memory_space<vmem>>, %arg4: memref<1x128xf32, #tpu.memory_space<vmem>>, %arg5: memref<16x128xf32, #tpu.memory_space<vmem>>) attributes {dimension_semantics = [#tpu.dimension_semantics<parallel>, #tpu.dimension_semantics<parallel>], iteration_bounds = array<i64: 1, 1>, scalar_prefetch = 0 : i64, scratch_operands = 0 : i64, tpu.core_type = #tpu.core_type<tc>, window_params = [{transform_indices = @transform_0, window_bounds = array<i64: 16, 128>}, {transform_indices = @transform_1, window_bounds = array<i64: 128, 128>}, {transform_indices = @transform_2, window_bounds = array<i64: 1, 128>}, {transform_indices = @transform_3, window_bounds = array<i64: 16, 128>}]} {
    %c0 = arith.constant 0 : index
    %c0_0 = arith.constant 0 : index
    %0 = vector.load %arg2[%c0, %c0_0] : memref<16x128xf32, #tpu.memory_space<vmem>>, vector<16x128xf32>
    %c0_1 = arith.constant 0 : index
    %c0_2 = arith.constant 0 : index
    %1 = vector.load %arg3[%c0_1, %c0_2] : memref<128x128xf32, #tpu.memory_space<vmem>>, vector<128x128xf32>
    %cst = arith.constant dense<0.000000e+00> : vector<16x128xf32>
    %2 = tpu.matmul %0, %1, %cst {dimension_numbers = #tpu.dot_dimension_numbers<[1], [0], [0], [1], [0, 0, 1, 1], [], []>} : vector<16x128xf32>, vector<128x128xf32>, vector<16x128xf32> -> vector<16x128xf32>
    %c0_3 = arith.constant 0 : index
    %c0_4 = arith.constant 0 : index
    %3 = vector.load %arg4[%c0_3, %c0_4] : memref<1x128xf32, #tpu.memory_space<vmem>>, vector<1x128xf32>
    %4 = vector.broadcast %3 : vector<1x128xf32> to vector<16x128xf32>
    %5 = arith.addf %2, %4 : vector<16x128xf32>
    %c0_5 = arith.constant 0 : index
    %c0_6 = arith.constant 0 : index
    %6 = vector.load %arg5[%c0_5, %c0_6] : memref<16x128xf32, #tpu.memory_space<vmem>>, vector<16x128xf32>
    tpu.vector_store %arg5[%c0_5, %c0_6], %5 {strides = array<i32>} : memref<16x128xf32, #tpu.memory_space<vmem>>, vector<16x128xf32>,
    return
  }
  func.func @transform_0(%arg0: i32, %arg1: i32) -> (i32, i32) {
    %c0_i32 = arith.constant 0 : i32
    %c0_i32_0 = arith.constant 0 : i32
    return %arg1, %c0_i32 : i32, i32
  }
  func.func @transform_1(%arg0: i32, %arg1: i32) -> (i32, i32) {
    %c0_i32 = arith.constant 0 : i32
    %c0_i32_0 = arith.constant 0 : i32
    return %c0_i32, %arg0 : i32, i32
  }
  func.func @transform_2(%arg0: i32, %arg1: i32) -> (i32, i32) {
    %c0_i32 = arith.constant 0 : i32
    %c0_i32_0 = arith.constant 0 : i32
    return %c0_i32, %arg0 : i32, i32
  }
  func.func @transform_3(%arg0: i32, %arg1: i32) -> (i32, i32) {
    %c0_i32 = arith.constant 0 : i32
    return %arg1, %arg0 : i32, i32
  }
}

</mosaic_0001>

<bundles_post_ra>
// kernel: tpu_custom_call.1
= control target key start
LH: loop header
LB: loop body
LE: loop exit
PB: predicated region body
PF: predicated region fallthrough
CT: control target
= control target key end

     0   :  { %6 = vsyncpa [#allocation3], 0  ;;  %s106_s0 = inlined_call_operand.hbm [shape: f32[8,128], index: 0, kind: input, shape index: {}]   ;;  %s107_s1 = inlined_call_operand.hbm [shape: f32[8,128], index: 1, kind: output, shape index: {}]  }
   0x1   :  { %7 = vsyncpa [#allocation4], 0  ;;  %s87_s6 = smov [#allocation2]  }
   0x2   :  { %s14_s7 = sshll.u32 %s87_s6, 4  ;;  %s15_s7 = int_to_ptr.vmem [resolvable:$true] %s14_s7 }
   0x3   :  { %s51_s8 = scalar_lea.vmem %s15_s7, 128  ;;  %p56_p1 = scmp.lt.s32.totalorder %s15_s7, %s15_s7 }
   0x4   :  { %p52_p0 = scmp.ne.s32.totalorder %s15_s7, %s51_s8  ;;  %p57_p2 = scmp.lt.s32.totalorder %s51_s8, %s51_s8 }
   0x6   :  { %p58_p3 = por %p57_p2, %p56_p1 }
   0x8   :  { %p59_p4 = pnand %p58_p3, %p52_p0 }
   0xa   :  { %62 = shalt.err (!%p59_p4)
}
   0xb   :  { %17 = dma.hbm_to_vmem [thread:$0]  %s106_s0, 128, %s15_s7, [#allocation3]  }
   0xc   :  { %83 = dma.done.wait [#allocation3], 128  }
   0xd   :  { %84 = vsyncadd [#allocation3], 4294967168  ;;  %v21_v0 = vld [vmem:[#allocation2] sm:$0xff]  ;;  %s88_s11 = smov 1   ;;  %s89_s12 = smov [#allocation5]  }
   0xe   :  { %22 = vrot.lane.b32.xlu0 %v21_v0, %s88_s11  ;;  %s31_s13 = sshll.u32 %s89_s12, 4  ;;  %s32_s13 = int_to_ptr.vmem [resolvable:$true] %s31_s13 }
   0xf   :  { %s63_s14 = scalar_lea.vmem %s32_s13, 128  ;;  %p68_p6 = scmp.lt.s32.totalorder %s32_s13, %s32_s13 }
  0x10   :  { %p64_p5 = scmp.ne.s32.totalorder %s32_s13, %s63_s14  ;;  %p69_p7 = scmp.lt.s32.totalorder %s63_s14, %s63_s14 }
  0x12   :  { %p70_p8 = por %p69_p7, %p68_p6 }
  0x14   :  { %p71_p9 = pnand %p70_p8, %p64_p5 }
  0x80   :  { %v23_v1 = vpop.permute.xlu0 %22 }
  0x81   :  { %24 = vst [vmem:[#allocation5] sm:$0xff] %v23_v1 }
  0x82   :  { %74 = shalt.err (!%p71_p9)
}
  0x83   :  { %34 = dma.vmem_to_hbm [thread:$0]  %s32_s13, 128, %s107_s1, [#allocation4]  }
  0x84   :  { %85 = dma.done.wait [#allocation4], 128  }
  0x85   :  { %86 = vsyncadd [#allocation4], 4294967168 }
  0x86   :  { %38 = vsyncpa [#allocation3], 1 }
  0x87   :  { %39 = vsyncpa [#allocation4], 1 }

// kernel: tpu_custom_call.1
= control target key start
LH: loop header
LB: loop body
LE: loop exit
PB: predicated region body
PF: predicated region fallthrough
CT: control target
= control target key end

     0   :  { %8 = vsyncpa [#allocation3], 0  ;;  %s334_s0 = inlined_call_operand.hbm [shape: f32[16,128], index: 0, kind: input, shape index: {}]   ;;  %s335_s1 = inlined_call_operand.hbm [shape: f32[128,128], index: 1, kind: input, shape index: {}]   ;;  %s336_s2 = inlined_call_operand.vmem [shape: f32[1,128], index: 2, kind: input, shape index: {}]   ;;  %s337_s3 = inlined_call_operand.hbm [shape: f32[16,128], index: 3, kind: output, shape index: {}]  }
   0x1   :  { %9 = vsyncpa [#allocation6], 0 }
   0x2   :  { %10 = vsyncpa [#allocation4], 0  ;;  %s288_s12 = smov [#allocation2]  }
   0x3   :  { %s16_s13 = sshll.u32 %s288_s12, 4  ;;  %s17_s13 = int_to_ptr.vmem [resolvable:$true] %s16_s13 }
   0x4   :  { %s230_s14 = scalar_lea.vmem %s17_s13, 256  ;;  %p235_p1 = scmp.lt.s32.totalorder %s17_s13, %s17_s13 }
   0x5   :  { %p231_p0 = scmp.ne.s32.totalorder %s17_s13, %s230_s14  ;;  %p236_p2 = scmp.lt.s32.totalorder %s230_s14, %s230_s14 }
   0x7   :  { %p237_p3 = por %p236_p2, %p235_p1 }
   0x9   :  { %p238_p4 = pnand %p237_p3, %p231_p0 }
   0xb   :  { %241 = shalt.err (!%p238_p4)
}
   0xc   :  { %s289_s15 = smov 128   ;;  %s290_s16 = smov 8  }
   0xd   :  { %22 = dma.hbm_to_vmem [thread:$0]  %s334_s0, 256, %s17_s13, [#allocation3], %s289_s15, %s289_s15, %s290_s16  }
   0xe   :  { %s291_s19 = smov [#allocation5]  }
   0xf   :  { %s28_s20 = sshll.u32 %s291_s19, 4  ;;  %s29_s20 = int_to_ptr.vmem [resolvable:$true] %s28_s20 }
  0x10   :  { %s250_s21 = scalar_lea.vmem %s29_s20, 2048  ;;  %p255_p6 = scmp.lt.s32.totalorder %s29_s20, %s29_s20 }
  0x11   :  { %p251_p5 = scmp.ne.s32.totalorder %s29_s20, %s250_s21  ;;  %p256_p7 = scmp.lt.s32.totalorder %s250_s21, %s250_s21 }
  0x13   :  { %p257_p8 = por %p256_p7, %p255_p6 }
  0x15   :  { %p258_p9 = pnand %p257_p8, %p251_p5 }
  0x17   :  { %261 = shalt.err (!%p258_p9)
}
  0x18   :  { %34 = dma.hbm_to_vmem [thread:$0]  %s335_s1, 2048, %s29_s20, [#allocation6], %s289_s15, %s289_s15, %s290_s16  }
  0x19   :  { %282 = dma.done.wait [#allocation3], 256  }
  0x1a   :  { %283 = vsyncadd [#allocation3], 4294967040 }
  0x1b   :  { %284 = dma.done.wait [#allocation6], 2048  }
  0x1c   :  { %285 = vsyncadd [#allocation6], 4294965248  ;;  %v60_v0 = vld [vmem:[#allocation5 + $0x78] sm:$0xff]  ;;  %v59_v1 = vld [vmem:[#allocation5 + $0x70] sm:$0xff]  ;;  %s292_s24 = smov [#allocation7]  }
  0x1d   :  { %182 = vmatprep.subr.mxu0 %v60_v0  ;;  %v58_v2 = vld [vmem:[#allocation5 + $0x68] sm:$0xff]  ;;  %v57_v3 = vld [vmem:[#allocation5 + $0x60] sm:$0xff]  ;;  %v43_v4 = vld [vmem:[#allocation2] sm:$0xff]  ;;  %s150_s25 = sshll.u32 %s292_s24, 4  ;;  %s151_s25 = int_to_ptr.vmem [resolvable:$true] %s150_s25 }
  0x1e   :  { %183 = vmatpush3.msra.mxu0 %v60_v0  ;;  %v56_v5 = vld [vmem:[#allocation5 + $0x58] sm:$0xff]  ;;  %214 = vmatprep.mubr.f32.mxu0 %v43_v4  ;;  %v55_v6 = vld [vmem:[#allocation5 + $0x50] sm:$0xff]  ;;  %v54_v7 = vld [vmem:[#allocation5 + $0x48] sm:$0xff]  ;;  %s262_s26 = scalar_lea.vmem %s151_s25, 256  ;;  %p267_p11 = scmp.lt.s32.totalorder %s151_s25, %s151_s25 }
  0x1f   :  { %184 = vmatprep.subr.mxu0 %v59_v1  ;;  %v53_v8 = vld [vmem:[#allocation5 + $0x40] sm:$0xff]  ;;  %v52_v9 = vld [vmem:[#allocation5 + $0x38] sm:$0xff]  ;;  %v51_v10 = vld [vmem:[#allocation5 + $0x30] sm:$0xff]  ;;  %p263_p10 = scmp.ne.s32.totalorder %s151_s25, %s262_s26  ;;  %p268_p12 = scmp.lt.s32.totalorder %s262_s26, %s262_s26 }
  0x20   :  { %185 = vmatpush3.msra.mxu0 %v59_v1  ;;  %v50_v11 = vld [vmem:[#allocation5 + $0x28] sm:$0xff]  ;;  %v49_v12 = vld [vmem:[#allocation5 + $0x20] sm:$0xff]  ;;  %v48_v13 = vld [vmem:[#allocation5 + $0x18] sm:$0xff] }
  0x21   :  { %186 = vmatprep.subr.mxu0 %v58_v2  ;;  %v47_v14 = vld [vmem:[#allocation5 + $0x10] sm:$0xff]  ;;  %v46_v15 = vld [vmem:[#allocation5 + $0x8] sm:$0xff]  ;;  %v45_v16 = vld [vmem:[#allocation5] sm:$0xff]  ;;  %p269_p13 = por %p268_p12, %p267_p11 }
  0x22   :  { %187 = vmatpush3.msra.mxu0 %v58_v2  ;;  %v44_v17 = vld [vmem:[#allocation2 + $0x8] sm:$0xff]  ;;  %v163_v18 = vld [vmem:[%s336_s2] ss:$0 sm:$0xff] }
  0x23   :  { %188 = vmatprep.subr.mxu0 %v57_v3  ;;  %p270_p0 = pnand %p269_p13, %p263_p10 }
  0x24   :  { %189 = vmatpush3.msra.mxu0 %v57_v3 }
  0x25   :  { %190 = vmatprep.subr.mxu0 %v56_v5 }
  0x26   :  { %191 = vmatpush3.msra.mxu0 %v56_v5 }
  0x27   :  { %192 = vmatprep.subr.mxu0 %v55_v6 }
  0x28   :  { %193 = vmatpush3.msra.mxu0 %v55_v6 }
  0x29   :  { %194 = vmatprep.subr.mxu0 %v54_v7 }
  0x2a   :  { %195 = vmatpush3.msra.mxu0 %v54_v7 }
  0x2b   :  { %196 = vmatprep.subr.mxu0 %v53_v8 }
  0x2c   :  { %197 = vmatpush3.msra.mxu0 %v53_v8 }
  0x2d   :  { %198 = vmatprep.subr.mxu0 %v52_v9 }
  0x2e   :  { %199 = vmatpush3.msra.mxu0 %v52_v9 }
  0x2f   :  { %200 = vmatprep.subr.mxu0 %v51_v10 }
  0x30   :  { %201 = vmatpush3.msra.mxu0 %v51_v10 }
  0x31   :  { %202 = vmatprep.subr.mxu0 %v50_v11 }
  0x32   :  { %203 = vmatpush3.msra.mxu0 %v50_v11 }
  0x33   :  { %204 = vmatprep.subr.mxu0 %v49_v12 }
  0x34   :  { %205 = vmatpush3.msra.mxu0 %v49_v12 }
  0x35   :  { %206 = vmatprep.subr.mxu0 %v48_v13 }
  0x36   :  { %207 = vmatpush3.msra.mxu0 %v48_v13 }
  0x37   :  { %208 = vmatprep.subr.mxu0 %v47_v14 }
  0x38   :  { %209 = vmatpush3.msra.mxu0 %v47_v14 }
  0x39   :  { %210 = vmatprep.subr.mxu0 %v46_v15 }
  0x3a   :  { %211 = vmatpush3.msra.mxu0 %v46_v15 }
  0x3b   :  { %212 = vmatprep.subr.mxu0 %v45_v16 }
  0x3c   :  { %213 = vmatpush3.msra.mxu0 %v45_v16 }
  0x3d   :  { %215 = vmatmul.mubr.f32.vlgmr.msra.gmra.mxu0 %v44_v17 }
  0xfd   :  { %v216_v19 = vpop.f32.mrf.mxu0 }
  0xfe   :  { %v140_v20 = vadd.f32 %v216_v19, %v163_v18 }
  0xff   :  { %v134_v21 = vpop.f32.mrf.mxu0 }
 0x100   :  { %144 = vst [vmem:[#allocation7 + $0x8] sm:$0xff] %v140_v20  ;;  %v135_v22 = vadd.f32 %v163_v18, %v134_v21 }
 0x102   :  { %143 = vst [vmem:[#allocation7] sm:$0xff] %v135_v22 }
 0x103   :  { %273 = shalt.err (!%p270_p0)
}
 0x104   :  { %156 = dma.vmem_to_hbm [thread:$0]  %s151_s25, 256, %s337_s3, [#allocation4], %s289_s15, %s289_s15, %s290_s16  }
 0x105   :  { %286 = dma.done.wait [#allocation4], 256  }
 0x106   :  { %287 = vsyncadd [#allocation4], 4294967040 }
 0x107   :  { %160 = vsyncpa [#allocation3], 1 }
 0x108   :  { %161 = vsyncpa [#allocation6], 1 }
 0x109   :  { %162 = vsyncpa [#allocation4], 1 }

</bundles_post_ra>
